<compile_context>
chip_gen: v7x
topology: tpu7x:2x2x1
jax: 0.10.0
libtpu: 0.0.40
codegen_flags: <defaults>
</compile_context>

<pallas_src>
import functools

import jax
import jax.numpy as jnp
from jax.experimental import pallas as pl
from jax.experimental.pallas import tpu as pltpu


# ------------------------------ grouped-GEMM kernel ------------------------------

def _moe_grouped_kernel(blk_exp_ref, blk_valid_ref,          # SMEM (NB,) int32 each
                        x_ref,                               # (tm, D)    bf16  rows of this block
                        w13_ref, b13_ref,                    # (D, 2F) bf16, (1, 2F) f32
                        w2_ref, b2_ref,                      # (F, D)  bf16, (1, D)  f32
                        o_ref):                              # (tm, D) f32
    b = pl.program_id(0)
    F = w2_ref.shape[0]

    @pl.when(blk_valid_ref[b] > 0)
    def _compute():
        # single fused x @ [w1 | w3] MXU pass, f32 accumulation
        h = jnp.dot(x_ref[...], w13_ref[...],
                    preferred_element_type=jnp.float32) + b13_ref[...]
        h1 = h[:, :F]
        h3 = h[:, F:]
        g = (h1 * jax.nn.sigmoid(h1)) * h3                    # silu(w1 x) * (w3 x), f32
        o_ref[...] = jnp.dot(g.astype(jnp.bfloat16), w2_ref[...],
                             preferred_element_type=jnp.float32) + b2_ref[...]

    @pl.when(blk_valid_ref[b] == 0)
    def _zero():
        # Unused trailing block: its weight DMA is elided (same block index as the
        # previous step); just make sure the output rows are finite zeros.
        o_ref[...] = jnp.zeros(o_ref.shape, o_ref.dtype)


def _pick_row_tile(total_rows):
    """Row-block size: as large as possible (MXU M occupancy) without excessive padding."""
    for cand in (256, 128, 64, 32, 16, 8):
        if total_rows >= 8 * cand:
            return cand
    return 8


# ------------------------------ parameter preparation ------------------------------

def prepare_moe_params(p, n_shared):
    """Fuse w1|w3 and fold the shared MLP into n_shared virtual experts (done once)."""
    E, D, F = p["w1"].shape
    FS = p["ws1"].shape[1]
    assert FS == n_shared * F

    # routed experts: (E, D, 2F) / (E, 1, 2F)
    w13_r = jnp.concatenate([p["w1"], p["w3"]], axis=-1)
    b13_r = jnp.concatenate([p["b1"], p["b3"]], axis=-1)

    # shared MLP decomposed into n_shared SwiGLU chunks of width F
    ws1_c = p["ws1"].reshape(D, n_shared, F).transpose(1, 0, 2)       # (ns, D, F)
    ws3_c = p["ws3"].reshape(D, n_shared, F).transpose(1, 0, 2)
    w13_s = jnp.concatenate([ws1_c, ws3_c], axis=-1)                  # (ns, D, 2F)
    bs1_c = p["bs1"].reshape(1, n_shared, F).transpose(1, 0, 2)       # (ns, 1, F)
    bs3_c = p["bs3"].reshape(1, n_shared, F).transpose(1, 0, 2)
    b13_s = jnp.concatenate([bs1_c, bs3_c], axis=-1)                  # (ns, 1, 2F)
    w2_s = p["ws2"].reshape(n_shared, F, D)                           # (ns, F, D)
    # bs2 is added exactly once -> attach it to the first shared chunk only
    b2_s = jnp.concatenate(
        [p["bs2"][None], jnp.zeros((n_shared - 1, 1, D), jnp.float32)], axis=0)

    return {
        "wg_t": p["wg_t"],                                            # (D, E) f32
        "w13": jnp.concatenate([w13_r, w13_s], axis=0),               # (E_all, D, 2F) bf16
        "b13": jnp.concatenate([b13_r, b13_s], axis=0),               # (E_all, 1, 2F) f32
        "w2": jnp.concatenate([p["w2"], w2_s], axis=0),               # (E_all, F, D) bf16
        "b2": jnp.concatenate([p["b2"], b2_s], axis=0),               # (E_all, 1, D) f32
    }


# ----------------------------------- forward -----------------------------------

@functools.partial(jax.jit, static_argnames=("topk",))
def moe_forward(x, mp, *, topk):
    B, S, D = x.shape
    T = B * S
    E = mp["wg_t"].shape[1]                 # routed experts
    E_all, _, F2 = mp["w13"].shape          # routed + shared virtual experts
    F = F2 // 2
    n_shared = E_all - E

    x2 = x.reshape(T, D).astype(jnp.float32)

    # ---- gate (tiny GEMM + softmax + top_k) stays in XLA ----
    scores = jax.nn.softmax(
        jnp.dot(x2, mp["wg_t"], preferred_element_type=jnp.float32), axis=-1)
    gate_w, gate_idx = jax.lax.top_k(scores, topk)                    # (T, topk)

    # ---- build (token, expert, weight) rows: routed + shared virtual experts ----
    tok_r = jnp.repeat(jnp.arange(T, dtype=jnp.int32), topk)
    exp_r = gate_idx.reshape(-1).astype(jnp.int32)
    wgt_r = gate_w.reshape(-1).astype(jnp.float32)
    tok_s = jnp.tile(jnp.arange(T, dtype=jnp.int32), n_shared)
    exp_s = jnp.repeat(jnp.arange(E, E_all, dtype=jnp.int32), T)
    wgt_s = jnp.ones((n_shared * T,), jnp.float32)
    tok = jnp.concatenate([tok_r, tok_s])
    exp = jnp.concatenate([exp_r, exp_s])
    wgt = jnp.concatenate([wgt_r, wgt_s])
    R = T * (topk + n_shared)

    # ---- sort rows by expert, place each group at a row-tile-aligned offset ----
    tm = _pick_row_tile(R)
    order = jnp.argsort(exp)
    s_tok, s_exp, s_wgt = tok[order], exp[order], wgt[order]

    counts = jnp.bincount(exp, length=E_all).astype(jnp.int32)        # (E_all,)
    padded_counts = ((counts + tm - 1) // tm) * tm
    blocks_per = padded_counts // tm
    grp_start = jnp.concatenate(
        [jnp.zeros((1,), counts.dtype), jnp.cumsum(counts)[:-1]])
    grp_start_pad = jnp.concatenate(
        [jnp.zeros((1,), counts.dtype), jnp.cumsum(padded_counts)[:-1]])
    dest = (grp_start_pad[s_exp]
            + (jnp.arange(R, dtype=jnp.int32) - grp_start[s_exp])).astype(jnp.int32)

    NB = pl.cdiv(R, tm) + E_all            # static worst-case number of row blocks
    PAD = NB * tm

    x_bf = x2.astype(jnp.bfloat16)
    x_pad = jnp.zeros((PAD, D), jnp.bfloat16).at[dest].set(x_bf[s_tok])
    w_pad = jnp.zeros((PAD,), jnp.float32).at[dest].set(s_wgt)        # gate weight / row
    t_pad = jnp.zeros((PAD,), jnp.int32).at[dest].set(s_tok)          # combine target

    # ---- per-block metadata (scalar-prefetched into SMEM) ----
    blk_end = jnp.cumsum(blocks_per)
    nb_used = blk_end[-1]
    blk_ids = jnp.arange(NB, dtype=jnp.int32)
    blk_valid = (blk_ids < nb_used).astype(jnp.int32)
    blk_exp_raw = jnp.searchsorted(blk_end, blk_ids, side="right").astype(jnp.int32)
    # unused trailing blocks repeat the last expert (always present: shared expert)
    blk_exp = jnp.where(blk_valid > 0, blk_exp_raw, E_all - 1).astype(jnp.int32)

    # ---- VMEM budget (double-buffered blocks + headroom), explicit for v5e/v7x ----
    blk_bytes = (tm * D * 2 + D * 2 * F * 2 + 2 * F * 4 + F * D * 2 + D * 4
                 + tm * D * 4 + tm * 2 * F * 4)
    vmem_limit = int(min(64 * 1024 * 1024, max(16 * 1024 * 1024, 4 * blk_bytes)))

    cost = pl.CostEstimate(
        flops=2 * R * 3 * D * F,
        transcendentals=R * F,
        bytes_accessed=(R * D * 2 + PAD * D * 4
                        + NB * (D * 2 * F * 2 + 2 * F * 4 + F * D * 2 + D * 4)),
    )

    out_pad = pl.pallas_call(
        _moe_grouped_kernel,
        grid_spec=pltpu.PrefetchScalarGridSpec(
            num_scalar_prefetch=2,
            grid=(NB,),
            in_specs=[
                pl.BlockSpec((tm, D), lambda b, be, bv: (b, 0)),                # rows
                pl.BlockSpec((None, D, 2 * F), lambda b, be, bv: (be[b], 0, 0)),  # w13
                pl.BlockSpec((None, 1, 2 * F), lambda b, be, bv: (be[b], 0, 0)),  # b13
                pl.BlockSpec((None, F, D), lambda b, be, bv: (be[b], 0, 0)),      # w2
                pl.BlockSpec((None, 1, D), lambda b, be, bv: (be[b], 0, 0)),      # b2
            ],
            out_specs=pl.BlockSpec((tm, D), lambda b, be, bv: (b, 0)),
        ),
        out_shape=jax.ShapeDtypeStruct((PAD, D), jnp.float32),
        compiler_params=pltpu.CompilerParams(
            dimension_semantics=("parallel",),
            vmem_limit_bytes=vmem_limit),
        cost_estimate=cost,
    )(blk_exp, blk_valid, x_pad, mp["w13"], mp["b13"], mp["w2"], mp["b2"])

    # ---- combine: gate-weight the expert outputs and scatter-add back to tokens ----
    # padding rows have w_pad == 0 (and t_pad == 0), so they contribute nothing.
    y = jnp.zeros((T, D), jnp.float32).at[t_pad].add(out_pad * w_pad[:, None])
    return y.reshape(B, S, D)


# ---------------------------------- reference ----------------------------------

def moe_reference(x, params, topk):
    # Pure-JAX reference mirroring the torch module (bf16 matmul inputs, f32 accum).
    B, S, D = x.shape
    x2 = x.reshape(-1, D).astype(jnp.float32)
    scores = jax.nn.softmax(
        jnp.dot(x2, params["wg_t"], preferred_element_type=jnp.float32), axis=-1)
    w, idx = jax.lax.top_k(scores, topk)
    E = params["w1"].shape[0]
    xb = x2.astype(jnp.bfloat16)
    y = jnp.zeros_like(x2)
    for e in range(E):
        h1 = jnp.dot(xb, params["w1"][e], preferred_element_type=jnp.float32) + params["b1"][e]
        h3 = jnp.dot(xb, params["w3"][e], preferred_element_type=jnp.float32) + params["b3"][e]
        h = jax.nn.silu(h1) * h3
        o = jnp.dot(h.astype(jnp.bfloat16), params["w2"][e],
                    preferred_element_type=jnp.float32) + params["b2"][e]
        we = jnp.sum(jnp.where(idx == e, w, 0.0), axis=-1, keepdims=True)
        y = y + o * we
    h1 = jnp.dot(xb, params["ws1"], preferred_element_type=jnp.float32) + params["bs1"]
    h3 = jnp.dot(xb, params["ws3"], preferred_element_type=jnp.float32) + params["bs3"]
    z = jnp.dot((jax.nn.silu(h1) * h3).astype(jnp.bfloat16), params["ws2"],
                preferred_element_type=jnp.float32) + params["bs2"]
    return (y + z).reshape(B, S, D)


# ------------------------------------ main ------------------------------------

if __name__ == "__main__":
    # Small config consistent with ModelArgs (scaled down).
    B, S = 2, 8                # batch / seq
    D = 128                    # args.dim
    F = 256                    # args.moe_inter_dim (scaled down)
    E = 8                      # args.n_routed_experts (scaled down)
    TOPK = 2                   # args.n_activated_experts (scaled down)
    N_SHARED = 2               # args.n_shared_experts
    FS = N_SHARED * F

    key = jax.random.PRNGKey(0)
    ks = jax.random.split(key, 16)
    scale = 0.05
    bf16 = jnp.bfloat16

    raw_params = {
        # gate weight, pre-transposed (D, E) so scores = x @ Wg.T  (f32)
        "wg_t": jax.random.normal(ks[0], (D, E), jnp.float32) * scale,
        # routed experts, stacked, pre-transposed (in, out); weights bf16, biases f32
        "w1": (jax.random.normal(ks[1], (E, D, F), jnp.float32) * scale).astype(bf16),
        "b1": jax.random.normal(ks[2], (E, 1, F), jnp.float32) * scale,
        "w3": (jax.random.normal(ks[3], (E, D, F), jnp.float32) * scale).astype(bf16),
        "b3": jax.random.normal(ks[4], (E, 1, F), jnp.float32) * scale,
        "w2": (jax.random.normal(ks[5], (E, F, D), jnp.float32) * scale).astype(bf16),
        "b2": jax.random.normal(ks[6], (E, 1, D), jnp.float32) * scale,
        # shared-experts MLP
        "ws1": (jax.random.normal(ks[7], (D, FS), jnp.float32) * scale).astype(bf16),
        "bs1": jax.random.normal(ks[8], (1, FS), jnp.float32) * scale,
        "ws3": (jax.random.normal(ks[9], (D, FS), jnp.float32) * scale).astype(bf16),
        "bs3": jax.random.normal(ks[10], (1, FS), jnp.float32) * scale,
        "ws2": (jax.random.normal(ks[11], (FS, D), jnp.float32) * scale).astype(bf16),
        "bs2": jax.random.normal(ks[12], (1, D), jnp.float32) * scale,
    }
    moe_params = prepare_moe_params(raw_params, N_SHARED)

    x = jax.random.normal(ks[13], (B, S, D), jnp.float32)

    out = jax.block_until_ready(moe_forward(x, moe_params, topk=TOPK))
    ref = jax.block_until_ready(moe_reference(x, raw_params, TOPK))

    assert out.shape == (B, S, D)
    assert jnp.allclose(out, ref, atol=1e-2, rtol=1e-2), (
        float(jnp.max(jnp.abs(out - ref))))

    print("KERNEL_OK")
</pallas_src>

<mosaic_0001>
module attributes {stable_mosaic.version = 11 : i64} {
  func.func private @main(%arg0: i32) attributes {dimension_semantics = [#tpu.dimension_semantics<core_parallel>], iteration_bounds = array<i64: 2>, tpu.core_type = #tpu.core_type<sc_scalar_subcore>, window_params = []} {
    return
  }
}

module attributes {stable_mosaic.version = 11 : i64} {
  func.func private @main(%arg0: i32) attributes {dimension_semantics = [#tpu.dimension_semantics<core_parallel>], iteration_bounds = array<i64: 2>, tpu.core_type = #tpu.core_type<sc_scalar_subcore>, window_params = []} {
    return
  }
}

module attributes {stable_mosaic.version = 11 : i64} {
  func.func @_moe_grouped_kernel(%arg0: i32, %arg1: memref<18xi32, #tpu.memory_space<smem>>, %arg2: memref<18xi32, #tpu.memory_space<smem>>, %arg3: memref<8x128xbf16, #tpu.memory_space<vmem>>, %arg4: memref<1x128x512xbf16, #tpu.memory_space<vmem>>, %arg5: memref<1x1x512xf32, #tpu.memory_space<vmem>>, %arg6: memref<1x256x128xbf16, #tpu.memory_space<vmem>>, %arg7: memref<1x1x128xf32, #tpu.memory_space<vmem>>, %arg8: memref<8x128xf32, #tpu.memory_space<vmem>>) attributes {dimension_semantics = [#tpu.dimension_semantics<parallel>], iteration_bounds = array<i64: 18>, scalar_prefetch = 2 : i64, scratch_operands = 0 : i64, tpu.core_type = #tpu.core_type<tc>, window_params = [{transform_indices = @transform_0, window_bounds = array<i64: 8, 128>}, {transform_indices = @transform_1, window_bounds = array<i64: 1, 128, 512>}, {transform_indices = @transform_2, window_bounds = array<i64: 1, 1, 512>}, {transform_indices = @transform_3, window_bounds = array<i64: 1, 256, 128>}, {transform_indices = @transform_4, window_bounds = array<i64: 1, 1, 128>}, {transform_indices = @transform_5, window_bounds = array<i64: 8, 128>}]} {
    %0 = arith.index_cast %arg0 : i32 to index
    %1 = memref.load %arg2[%0] : memref<18xi32, #tpu.memory_space<smem>>
    %c0_i32 = arith.constant 0 : i32
    %2 = arith.cmpi sgt, %1, %c0_i32 : i32
    %3 = arith.extui %2 : i1 to i32
    %c0_i32_0 = arith.constant 0 : i32
    %4 = arith.cmpi ne, %3, %c0_i32_0 : i32
    scf.if %4 {
      %c0 = arith.constant 0 : index
      %c0_3 = arith.constant 0 : index
      %10 = vector.load %arg3[%c0, %c0_3] : memref<8x128xbf16, #tpu.memory_space<vmem>>, vector<8x128xbf16>
      %c0_4 = arith.constant 0 : index
      %c0_5 = arith.constant 0 : index
      %c0_6 = arith.constant 0 : index
      %11 = vector.load %arg4[%c0_4, %c0_5, %c0_6] : memref<1x128x512xbf16, #tpu.memory_space<vmem>>, vector<1x128x512xbf16>
      %12 = vector.shape_cast %11 : vector<1x128x512xbf16> to vector<128x512xbf16>
      %cst = arith.constant dense<0.000000e+00> : vector<8x512xf32>
      %13 = tpu.matmul %10, %12, %cst {dimension_numbers = #tpu.dot_dimension_numbers<[1], [0], [0], [1], [0, 0, 1, 1], [], []>} : vector<8x128xbf16>, vector<128x512xbf16>, vector<8x512xf32> -> vector<8x512xf32>
      %c0_7 = arith.constant 0 : index
      %c0_8 = arith.constant 0 : index
      %c0_9 = arith.constant 0 : index
      %14 = vector.load %arg5[%c0_7, %c0_8, %c0_9] : memref<1x1x512xf32, #tpu.memory_space<vmem>>, vector<1x1x512xf32>
      %15 = vector.shape_cast %14 : vector<1x1x512xf32> to vector<1x512xf32>
      %16 = vector.broadcast %15 : vector<1x512xf32> to vector<8x512xf32>
      %17 = arith.addf %13, %16 : vector<8x512xf32>
      %18 = vector.extract_strided_slice %17 {offsets = [0, 0], sizes = [8, 256], strides = [1, 1]} : vector<8x512xf32> to vector<8x256xf32>
      %19 = vector.extract_strided_slice %17 {offsets = [0, 256], sizes = [8, 256], strides = [1, 1]} : vector<8x512xf32> to vector<8x256xf32>
      %20 = arith.negf %18 : vector<8x256xf32>
      %21 = math.exp %20 : vector<8x256xf32>
      %cst_10 = arith.constant 1.000000e+00 : f32
      %22 = vector.broadcast %cst_10 : f32 to vector<8x256xf32>
      %23 = arith.addf %22, %21 : vector<8x256xf32>
      %24 = arith.divf %22, %23 : vector<8x256xf32>
      %25 = arith.mulf %18, %24 : vector<8x256xf32>
      %26 = arith.mulf %25, %19 : vector<8x256xf32>
      %27 = arith.truncf %26 : vector<8x256xf32> to vector<8x256xbf16>
      %c0_11 = arith.constant 0 : index
      %c0_12 = arith.constant 0 : index
      %c0_13 = arith.constant 0 : index
      %28 = vector.load %arg6[%c0_11, %c0_12, %c0_13] : memref<1x256x128xbf16, #tpu.memory_space<vmem>>, vector<1x256x128xbf16>
      %29 = vector.shape_cast %28 : vector<1x256x128xbf16> to vector<256x128xbf16>
      %cst_14 = arith.constant dense<0.000000e+00> : vector<8x128xf32>
      %30 = tpu.matmul %27, %29, %cst_14 {dimension_numbers = #tpu.dot_dimension_numbers<[1], [0], [0], [1], [0, 0, 1, 1], [], []>} : vector<8x256xbf16>, vector<256x128xbf16>, vector<8x128xf32> -> vector<8x128xf32>
      %c0_15 = arith.constant 0 : index
      %c0_16 = arith.constant 0 : index
      %c0_17 = arith.constant 0 : index
      %31 = vector.load %arg7[%c0_15, %c0_16, %c0_17] : memref<1x1x128xf32, #tpu.memory_space<vmem>>, vector<1x1x128xf32>
      %32 = vector.shape_cast %31 : vector<1x1x128xf32> to vector<1x128xf32>
      %33 = vector.broadcast %32 : vector<1x128xf32> to vector<8x128xf32>
      %34 = arith.addf %30, %33 : vector<8x128xf32>
      %c0_18 = arith.constant 0 : index
      %c0_19 = arith.constant 0 : index
      %35 = vector.load %arg8[%c0_18, %c0_19] : memref<8x128xf32, #tpu.memory_space<vmem>>, vector<8x128xf32>
      tpu.vector_store %arg8[%c0_18, %c0_19], %34 {strides = array<i32>} : memref<8x128xf32, #tpu.memory_space<vmem>>, vector<8x128xf32>,
    } else {
    }
    %5 = arith.index_cast %arg0 : i32 to index
    %6 = memref.load %arg2[%5] : memref<18xi32, #tpu.memory_space<smem>>
    %c0_i32_1 = arith.constant 0 : i32
    %7 = arith.cmpi eq, %6, %c0_i32_1 : i32
    %8 = arith.extui %7 : i1 to i32
    %c0_i32_2 = arith.constant 0 : i32
    %9 = arith.cmpi ne, %8, %c0_i32_2 : i32
    scf.if %9 {
      %cst = arith.constant 0.000000e+00 : f32
      %10 = vector.broadcast %cst : f32 to vector<8x128xf32>
      %c0 = arith.constant 0 : index
      %c0_3 = arith.constant 0 : index
      %11 = vector.load %arg8[%c0, %c0_3] : memref<8x128xf32, #tpu.memory_space<vmem>>, vector<8x128xf32>
      tpu.vector_store %arg8[%c0, %c0_3], %10 {strides = array<i32>} : memref<8x128xf32, #tpu.memory_space<vmem>>, vector<8x128xf32>,
    } else {
    }
    return
  }
  func.func @transform_0(%arg0: i32, %arg1: memref<18xi32, #tpu.memory_space<smem>>, %arg2: memref<18xi32, #tpu.memory_space<smem>>) -> (i32, i32) {
    %c0_i32 = arith.constant 0 : i32
    %c0_i32_0 = arith.constant 0 : i32
    return %arg0, %c0_i32 : i32, i32
  }
  func.func @transform_1(%arg0: i32, %arg1: memref<18xi32, #tpu.memory_space<smem>>, %arg2: memref<18xi32, #tpu.memory_space<smem>>) -> (i32, i32, i32) {
    %0 = arith.index_cast %arg0 : i32 to index
    %1 = memref.load %arg1[%0] : memref<18xi32, #tpu.memory_space<smem>>
    %c0_i32 = arith.constant 0 : i32
    %c0_i32_0 = arith.constant 0 : i32
    %c0_i32_1 = arith.constant 0 : i32
    return %1, %c0_i32, %c0_i32_0 : i32, i32, i32
  }
  func.func @transform_2(%arg0: i32, %arg1: memref<18xi32, #tpu.memory_space<smem>>, %arg2: memref<18xi32, #tpu.memory_space<smem>>) -> (i32, i32, i32) {
    %0 = arith.index_cast %arg0 : i32 to index
    %1 = memref.load %arg1[%0] : memref<18xi32, #tpu.memory_space<smem>>
    %c0_i32 = arith.constant 0 : i32
    %c0_i32_0 = arith.constant 0 : i32
    %c0_i32_1 = arith.constant 0 : i32
    return %1, %c0_i32, %c0_i32_0 : i32, i32, i32
  }
  func.func @transform_3(%arg0: i32, %arg1: memref<18xi32, #tpu.memory_space<smem>>, %arg2: memref<18xi32, #tpu.memory_space<smem>>) -> (i32, i32, i32) {
    %0 = arith.index_cast %arg0 : i32 to index
    %1 = memref.load %arg1[%0] : memref<18xi32, #tpu.memory_space<smem>>
    %c0_i32 = arith.constant 0 : i32
    %c0_i32_0 = arith.constant 0 : i32
    %c0_i32_1 = arith.constant 0 : i32
    return %1, %c0_i32, %c0_i32_0 : i32, i32, i32
  }
  func.func @transform_4(%arg0: i32, %arg1: memref<18xi32, #tpu.memory_space<smem>>, %arg2: memref<18xi32, #tpu.memory_space<smem>>) -> (i32, i32, i32) {
    %0 = arith.index_cast %arg0 : i32 to index
    %1 = memref.load %arg1[%0] : memref<18xi32, #tpu.memory_space<smem>>
    %c0_i32 = arith.constant 0 : i32
    %c0_i32_0 = arith.constant 0 : i32
    %c0_i32_1 = arith.constant 0 : i32
    return %1, %c0_i32, %c0_i32_0 : i32, i32, i32
  }
  func.func @transform_5(%arg0: i32, %arg1: memref<18xi32, #tpu.memory_space<smem>>, %arg2: memref<18xi32, #tpu.memory_space<smem>>) -> (i32, i32) {
    %c0_i32 = arith.constant 0 : i32
    %c0_i32_0 = arith.constant 0 : i32
    return %arg0, %c0_i32 : i32, i32
  }
}

</mosaic_0001>

<bundles_post_ra>
// kernel: custom-call.1
= control target key start
LH: loop header
LB: loop body
LE: loop exit
PB: predicated region body
PF: predicated region fallthrough
CT: control target
= control target key end

     0   :  { %s6_s0 = inlined_call_operand.vmem [shape: u32[18], index: 0, kind: output, shape index: {}]  }

// kernel: moe_forward.1
= control target key start
LH: loop header
LB: loop body
LE: loop exit
PB: predicated region body
PF: predicated region fallthrough
CT: control target
= control target key end

     0   :  { %s1300_s0 = inlined_call_operand.vmem [shape: s32[18], index: 0, kind: input, shape index: {}]   ;;  %s1301_s2 = inlined_call_operand.vmem [shape: bf16[144,128], index: 2, kind: input, shape index: {}]   ;;  %s1302_s3 = inlined_call_operand.vmem [shape: bf16[10,128,512], index: 3, kind: input, shape index: {}]   ;;  %s1303_s4 = inlined_call_operand.vmem [shape: f32[10,1,512], index: 4, kind: input, shape index: {}]   ;;  %s1304_s5 = inlined_call_operand.vmem [shape: bf16[10,256,128], index: 5, kind: input, shape index: {}]   ;;  %s1305_s6 = inlined_call_operand.vmem [shape: f32[10,1,128], index: 6, kind: input, shape index: {}]   ;;  %s1306_s7 = inlined_call_operand.vmem [shape: f32[144,128], index: 7, kind: output, shape index: {}]   ;;  %s1307_s1 = inlined_call_operand.vmem [shape: s32[18], index: 1, kind: input, shape index: {}]  }
   0x1   :  { %s12_s26 = sshll.u32 %s1300_s0, 4  ;;  %s16_s29 = sshll.u32 %s1307_s1, 4  ;;  %s13_s26 = int_to_ptr.vmem [resolvable:$true] %s12_s26  ;;  %s17_s29 = int_to_ptr.vmem [resolvable:$true] %s16_s29 }
   0x2   :  { %s1107_s30 = scalar_lea.vmem %s13_s26, 16  ;;  %p1112_p1 = scmp.lt.s32.totalorder %s13_s26, %s13_s26 }
   0x3   :  { %p1108_p0 = scmp.ne.s32.totalorder %s13_s26, %s1107_s30  ;;  %p1113_p2 = scmp.lt.s32.totalorder %s1107_s30, %s1107_s30 }
   0x5   :  { %p1114_p3 = por %p1113_p2, %p1112_p1 }
   0x7   :  { %p1115_p4 = pnand %p1114_p3, %p1108_p0 }
   0x9   :  { %1118 = shalt.err (!%p1115_p4)  }
   0xa   :  { %s1141_s8 = smov [#allocation3]   ;;  %s1119_s9 = scalar_lea.vmem %s17_s29, 16 }
   0xb   :  { %15 = dma.vmem_to_smem %s13_s26, 16, %s1141_s8, [#allocation2] }
   0xc   :  { %p1120_p5 = scmp.ne.s32.totalorder %s17_s29, %s1119_s9  ;;  %p1124_p6 = scmp.lt.s32.totalorder %s17_s29, %s17_s29 }
   0xd   :  { %p1125_p7 = scmp.lt.s32.totalorder %s1119_s9, %s1119_s9 }
   0xf   :  { %p1126_p8 = por %p1125_p7, %p1124_p6 }
  0x11   :  { %p1127_p9 = pnand %p1126_p8, %p1120_p5 }
  0x13   :  { %1130 = shalt.err (!%p1127_p9)  }
  0x14   :  { %s1142_s0 = smov [#allocation4]  }
  0x15   :  { %19 = dma.vmem_to_smem %s17_s29, 16, %s1142_s0, [#allocation2] }
  0x16   :  { %1135 = dma.done.wait [#allocation2], 32 }
  0x17   :  { %1136 = vsyncadd [#allocation2], 4294967264 }
  0x18   :  { %21 = sfence }
  0x19   :  { %s1191_s1 = smov 0  }
  0x1a LB: > { %s1197_s10 = sadd.s32 4294967295, %s1139_s1   ;;  %p936_p10 = scmp.ge.s32.totalorder %s1139_s1, 1  ;;  %s1139_s1 = sphi %s1191_s1, %s27_s1  }
  0x1b   : > { %p251_p11 = scmp.lt.s32.totalorder %s1139_s1, 19 }
  0x1d   : > { %p252_p12 = pnand %p936_p10, %p251_p11 }
  0x1e   : > { %p298_p13 = scmp.lt.s32.totalorder (!%p252_p12), %s1197_s10, 17  ;;  %s302_s11 = sld [smem:[#allocation3 + %s1197_s10]] (!%p252_p12) }
  0x1f   : > { %255 = sbr.rel (%p252_p12) target bundleno = 563 (0x233), region = 40  ;;  %s309_s12 = sld [smem:[#allocation3 + %s1197_s10]] (!%p252_p12) }
  0x20   : > { %s315_s13 = sld [smem:[#allocation3 + %s1197_s10]] (!%p252_p12) }
  0x21   : > { %s322_s15 = sld [smem:[#allocation3 + %s1197_s10]] (!%p252_p12) }
  0x22   : > { %s332_s16 = sld [smem:[#allocation4 + %s1197_s10]] (!%p252_p12) }
  0x24   : > { %p303_p0 = scmp.lt.s32.totalorder (!%p252_p12), %s302_s11, 9 }
  0x25   : > { %p310_p1 = scmp.lt.s32.totalorder (!%p252_p12), %s309_s12, 9 }
  0x26   : > { %s299_s14 = scalar_select %p298_p13, %s1197_s10, 17 }
  0x27   : > { %p316_p2 = scmp.lt.s32.totalorder %s315_s13, 9  ;;  %s1309_s11 = smov (!%p303_p0, %s302_s11), 9 }
  0x28   : > { %s937_s17 = sshll.u32 %s299_s14, 2  ;;  %s943_s18 = sshll.u32 %s299_s14, 3 }
  0x29   : > { %s1211_s21 = scalar_lea.vmem %s1301_s2, %s937_s17  ;;  %s1216_s24 = scalar_lea.vmem %s1306_s7, %s943_s18 }
  0x2a   : > { %s1311_s12 = smov (!%p310_p1, %s309_s12), 9  ;;  %s999_s25 = sshll.u32 %s1309_s11, 8 }
  0x2b   : > { %p323_p3 = scmp.lt.s32.totalorder %s322_s15, 9  ;;  %s1221_s28 = scalar_lea.vmem %s1302_s3, %s999_s25 }
  0x2c   : > { %s940_s29 = sshll.u32 %s1311_s12, 2  ;;  %s1313_s13 = smov (!%p316_p2, %s315_s13), 9 }
  0x2d   : > { %s1226_s9 = scalar_lea.vmem %s1303_s4, %s940_s29  ;;  %s1315_s15 = smov (!%p323_p3, %s322_s15), 9 }
  0x2e   : > { %s1000_s0 = sshll.u32 %s1313_s13, 7  ;;  %s325_s20 = scalar_lea.vmem %s1305_s6, %s1315_s15 }
  0x2f   : > { %s1233_s11 = scalar_lea.vmem %s1304_s5, %s1000_s0  ;;  %p944_p4 = scmp.le.s32.totalorder %s332_s16, 0 }
  0x30   : > { %v1035_v0 = vld [vmem:[%s1221_s28 + $0x4] ss:$16 sps:$4 sm:$0xff] (!%p944_p4)   ;;  %v1037_v1 = vld [vmem:[%s1221_s28] ss:$16 sps:$4 sm:$0xff] (!%p944_p4)   ;;  %v1143_v2 = vmov (!%p944_p4), 0   ;;  %v1085_v36 = vld [vmem:[%s1233_s11 + $0x48] sm:$0xff] (!%p944_p4)   ;;  %v372_v50 = vlaneseq (!%p944_p4) }
  0x31   : > { %336 = sbr.rel (%p944_p4) target bundleno = 548 (0x224), region = 44  ;;  %584 = vmatprep.mubr.bf16.mxu0 (!%p944_p4), %v1143_v2  ;;  %625 = vmatprep.mubr.bf16.mxu1 (!%p944_p4), %v1143_v2  ;;  %v1038_v3 = vld [vmem:[%s1221_s28 + $0x24] ss:$16 sps:$4 sm:$0xff] (!%p944_p4)   ;;  %v1040_v4 = vld [vmem:[%s1221_s28 + $0x20] ss:$16 sps:$4 sm:$0xff] (!%p944_p4)   ;;  %v1086_v37 = vld [vmem:[%s1233_s11 + $0x8] sm:$0xff] (!%p944_p4)  }
  0x32   : > { %552 = vmatprep.subr.bf16.mxu0 (!%p944_p4), %v1035_v0  ;;  %v1041_v5 = vld [vmem:[%s1221_s28 + $0x44] ss:$16 sps:$4 sm:$0xff] (!%p944_p4)   ;;  %v1043_v6 = vld [vmem:[%s1221_s28 + $0x40] ss:$16 sps:$4 sm:$0xff] (!%p944_p4)   ;;  %v1056_v8 = vld [vmem:[%s1221_s28 + $0xc] ss:$16 sps:$4 sm:$0xff] (!%p944_p4)  }
  0x33   : > { %553 = vmatpush1.bf16.msra.mxu0 (!%p944_p4), %v1037_v1  ;;  %v1044_v7 = vld [vmem:[%s1221_s28 + $0x64] ss:$16 sps:$4 sm:$0xff] (!%p944_p4)   ;;  %v1058_v9 = vld [vmem:[%s1221_s28 + $0x8] ss:$16 sps:$4 sm:$0xff] (!%p944_p4)   ;;  %v1046_v10 = vld [vmem:[%s1221_s28 + $0x60] ss:$16 sps:$4 sm:$0xff] (!%p944_p4)   ;;  %593 = vmatprep.subr.bf16.mxu1 (!%p944_p4), %v1056_v8 }
  0x34   : > { %554 = vmatprep.subr.bf16.mxu0 (!%p944_p4), %v1038_v3  ;;  %v1047_v11 = vld [vmem:[%s1221_s28 + $0x84] ss:$16 sps:$4 sm:$0xff] (!%p944_p4)   ;;  %v1062_v12 = vld [vmem:[%s1221_s28 + $0x2c] ss:$16 sps:$4 sm:$0xff] (!%p944_p4)   ;;  %594 = vmatpush1.bf16.msra.mxu1 (!%p944_p4), %v1058_v9  ;;  %v1064_v13 = vld [vmem:[%s1221_s28 + $0x28] ss:$16 sps:$4 sm:$0xff] (!%p944_p4)  }
  0x35   : > { %595 = vmatprep.subr.bf16.mxu1 (!%p944_p4), %v1062_v12  ;;  %v1065_v14 = vld [vmem:[%s1221_s28 + $0x4c] ss:$16 sps:$4 sm:$0xff] (!%p944_p4)   ;;  %v1049_v15 = vld [vmem:[%s1221_s28 + $0x80] ss:$16 sps:$4 sm:$0xff] (!%p944_p4)   ;;  %v1050_v16 = vld [vmem:[%s1221_s28 + $0xa4] ss:$16 sps:$4 sm:$0xff] (!%p944_p4)  }
  0x36   : > { %v1067_v17 = vld [vmem:[%s1221_s28 + $0x48] ss:$16 sps:$4 sm:$0xff] (!%p944_p4)   ;;  %v1068_v18 = vld [vmem:[%s1221_s28 + $0x6c] ss:$16 sps:$4 sm:$0xff] (!%p944_p4)   ;;  %v1052_v19 = vld [vmem:[%s1221_s28 + $0xa0] ss:$16 sps:$4 sm:$0xff] (!%p944_p4)  }
  0x37   : > { %555 = vmatpush1.bf16.msra.mxu0 (!%p944_p4), %v1040_v4  ;;  %v1053_v20 = vld [vmem:[%s1221_s28 + $0xc4] ss:$16 sps:$4 sm:$0xff] (!%p944_p4)   ;;  %v1055_v21 = vld [vmem:[%s1221_s28 + $0xc0] ss:$16 sps:$4 sm:$0xff] (!%p944_p4)   ;;  %v1070_v22 = vld [vmem:[%s1221_s28 + $0x68] ss:$16 sps:$4 sm:$0xff] (!%p944_p4)  }
  0x38   : > { %556 = vmatprep.subr.bf16.mxu0 %v1041_v5  ;;  %596 = vmatpush1.bf16.msra.mxu1 %v1064_v13  ;;  %v1071_v23 = vld [vmem:[%s1221_s28 + $0x8c] ss:$16 sps:$4 sm:$0xff]   ;;  %v1059_v24 = vld [vmem:[%s1221_s28 + $0xe4] ss:$16 sps:$4 sm:$0xff]   ;;  %v1073_v25 = vld [vmem:[%s1221_s28 + $0x88] ss:$16 sps:$4 sm:$0xff]  }
  0x39   : > { %597 = vmatprep.subr.bf16.mxu1 %v1065_v14  ;;  %v1074_v26 = vld [vmem:[%s1221_s28 + $0xac] ss:$16 sps:$4 sm:$0xff]   ;;  %v1061_v27 = vld [vmem:[%s1221_s28 + $0xe0] ss:$16 sps:$4 sm:$0xff]   ;;  %v1076_v28 = vld [vmem:[%s1221_s28 + $0xa8] ss:$16 sps:$4 sm:$0xff]  }
  0x3a   : > { %v1077_v29 = vld [vmem:[%s1221_s28 + $0xcc] ss:$16 sps:$4 sm:$0xff]   ;;  %v337_v30 = vld [vmem:[%s1211_s21] sm:$0xf]  ;;  %v1079_v31 = vld [vmem:[%s1221_s28 + $0xc8] ss:$16 sps:$4 sm:$0xff]  }
  0x3b   : > { %557 = vmatpush1.bf16.msra.mxu0 %v1043_v6  ;;  %v1080_v32 = vld [vmem:[%s1221_s28 + $0xec] ss:$16 sps:$4 sm:$0xff]   ;;  %v1082_v33 = vld [vmem:[%s1221_s28 + $0xe8] ss:$16 sps:$4 sm:$0xff]   ;;  %v1083_v34 = vld [vmem:[%s1233_s11 + $0x40] sm:$0xff]   ;;  %v373_v51 = vshrl.u32 %v372_v50, 7 }
  0x3c   : > { %558 = vmatprep.subr.bf16.mxu0 %v1044_v7  ;;  %598 = vmatpush1.bf16.msra.mxu1 %v1067_v17  ;;  %v1084_v35 = vld [vmem:[%s1233_s11] sm:$0xff]   ;;  %v1087_v38 = vld [vmem:[%s1233_s11 + $0x50] sm:$0xff]   ;;  %v1089_v40 = vld [vmem:[%s1233_s11 + $0x58] sm:$0xff]  }
  0x3d   : > { %599 = vmatprep.subr.bf16.mxu1 %v1068_v18  ;;  %v1088_v39 = vld [vmem:[%s1233_s11 + $0x10] sm:$0xff]   ;;  %v1090_v41 = vld [vmem:[%s1233_s11 + $0x18] sm:$0xff]   ;;  %v1091_v42 = vld [vmem:[%s1233_s11 + $0x60] sm:$0xff]   ;;  %v374_v52 = vsub.s32 0, %v373_v51  ;;  %v378_v54 = vsub.s32 1, %v373_v51  ;;  %v382_v9 = vsub.s32 2, %v373_v51 }
  0x3e   : > { %v1092_v43 = vld [vmem:[%s1233_s11 + $0x20] sm:$0xff]   ;;  %v1093_v44 = vld [vmem:[%s1233_s11 + $0x68] sm:$0xff]   ;;  %v1095_v46 = vld [vmem:[%s1233_s11 + $0x70] sm:$0xff]  }
  0x3f   : > { %559 = vmatpush1.bf16.msra.mxu0 %v1046_v10  ;;  %v1094_v45 = vld [vmem:[%s1233_s11 + $0x28] sm:$0xff]   ;;  %v1096_v47 = vld [vmem:[%s1233_s11 + $0x30] sm:$0xff]   ;;  %v1097_v48 = vld [vmem:[%s1233_s11 + $0x78] sm:$0xff]   ;;  %v386_v10 = vsub.s32 3, %v373_v51 }
  0x40   : > { %560 = vmatprep.subr.bf16.mxu0 %v1047_v11  ;;  %600 = vmatpush1.bf16.msra.mxu1 %v1070_v22  ;;  %v1098_v49 = vld [vmem:[%s1233_s11 + $0x38] sm:$0xff]   ;;  %v370_v53 = vld [vmem:[%s1226_s9] sm:$0xf] }
  0x41   : > { %601 = vmatprep.subr.bf16.mxu1 %v1071_v23  ;;  %v375_v55 = vrot.slane %v370_v53, %v374_v52  ;;  %v379_v56 = vrot.slane %v370_v53, %v378_v54  ;;  %v383_v11 = vrot.slane %v370_v53, %v382_v9  ;;  %v387_v12 = vrot.slane %v370_v53, %v386_v10 }
  0x43   : > { %561 = vmatpush1.bf16.msra.mxu0 %v1049_v15 }
  0x44   : > { %562 = vmatprep.subr.bf16.mxu0 %v1050_v16  ;;  %602 = vmatpush1.bf16.msra.mxu1 %v1073_v25 }
  0x45   : > { %603 = vmatprep.subr.bf16.mxu1 %v1074_v26 }
  0x47   : > { %563 = vmatpush1.bf16.msra.mxu0 %v1052_v19 }
  0x48   : > { %564 = vmatprep.subr.bf16.mxu0 %v1053_v20  ;;  %604 = vmatpush1.bf16.msra.mxu1 %v1076_v28 }
  0x49   : > { %605 = vmatprep.subr.bf16.mxu1 %v1077_v29 }
  0x4b   : > { %565 = vmatpush1.bf16.msra.mxu0 %v1055_v21 }
  0x4c   : > { %566 = vmatprep.subr.bf16.mxu0 %v1059_v24  ;;  %606 = vmatpush1.bf16.msra.mxu1 %v1079_v31  ;;  %v979_v24 = vld [vmem:[%s325_s20] ss:$0 sm:$0xff] }
  0x4d   : > { %607 = vmatprep.subr.bf16.mxu1 %v1080_v32 }
  0x4f   : > { %567 = vmatpush1.bf16.msra.mxu0 %v1061_v27 }
  0x50   : > { %608 = vmatpush1.bf16.msra.mxu1 %v1082_v33  ;;  %1001 = vmatprep.subr.bf16.mxu0 %v1083_v34 }
  0x52   : > { %585 = vmatmul.mubr.bf16.vlgmr.msra.gmra.mrb[0].mxu0 %v337_v30 }
  0x53   : > { %626 = vmatmul.mubr.bf16.vlgmr.msra.gmra.mrb[0].mxu1 %v337_v30  ;;  %1002 = vmatpush3.bf16.msra.mxu0 %v1084_v35 }
  0x54   : > { %1003 = vmatprep.subr.bf16.mxu0 %v1085_v36 }
  0x57   : > { %1004 = vmatpush3.bf16.msra.mxu0 %v1086_v37 }
  0x58   : > { %1005 = vmatprep.subr.bf16.mxu0 %v1087_v38 }
  0x5b   : > { %1006 = vmatpush3.bf16.msra.mxu0 %v1088_v39 }
  0x5c   : > { %1007 = vmatprep.subr.bf16.mxu0 %v1089_v40 }
  0x5f   : > { %1008 = vmatpush3.bf16.msra.mxu0 %v1090_v41 }
  0x60   : > { %1009 = vmatprep.subr.bf16.mxu0 %v1091_v42 }
  0x63   : > { %1010 = vmatpush3.bf16.msra.mxu0 %v1092_v43 }
  0x64   : > { %1011 = vmatprep.subr.bf16.mxu0 %v1093_v44 }
  0x67   : > { %1012 = vmatpush3.bf16.msra.mxu0 %v1094_v45 }
  0x68   : > { %1013 = vmatprep.subr.bf16.mxu0 %v1095_v46 }
  0x6b   : > { %1014 = vmatpush3.bf16.msra.mxu0 %v1096_v47 }
  0x6c   : > { %1015 = vmatprep.subr.bf16.mxu0 %v1097_v48 }
  0x6f   : > { %1016 = vmatpush3.bf16.msra.mxu0 %v1098_v49 }
 0x125   : > { %v586_v57 = vpop.f32.mrb[0].mxu0 }
 0x126   : > { %v587_v58 = vadd.f32 %v586_v57, %v375_v55  ;;  %v588_v59 = vpop.f32.mrb[1].mxu0  ;;  %v627_v1 = vpop.f32.mrb[0].mxu1 }
 0x127   : > { %v589_v60 = vadd.f32 %v588_v59, %v379_v56  ;;  %v590_v61 = vpop.f32.mrb[2].mxu0  ;;  %v629_v2 = vpop.f32.mrb[1].mxu1  ;;  %v628_v13 = vadd.f32 %v627_v1, %v383_v11 }
 0x128   : > { %v977_v62 = vmul.f32 -1.442695, %v587_v58  ;;  %v591_v63 = vpop.f32.mrb[3].mxu0  ;;  %v631_v3 = vpop.f32.mrb[2].mxu1  ;;  %v630_v15 = vadd.f32 %v629_v2, %v387_v12 }
 0x129   : > { %v978_v0 = vmul.f32 -1.442695, %v589_v60  ;;  %v632_v4 = vpop.f32.mrb[3].mxu1 }
 0x12a   : > { %1099 = vpow2.f32 %v977_v62 }
 0x12b   : > { %1101 = vpow2.f32 %v978_v0 }
 0x134   : > { %v1100_v5 = vpop.eup %1099 }
 0x135   : > { %v1102_v6 = vpop.eup %1101  ;;  %v640_v7 = vadd.f32 1.0, %v1100_v5 }
 0x136   : > { %v641_v8 = vadd.f32 1.0, %v1102_v6 }
 0x137   : > { %1103 = vrcp.f32 %v640_v7 }
 0x138   : > { %1105 = vrcp.f32 %v641_v8 }
 0x141   : > { %v1104_v14 = vpop.eup %1103 }
 0x142   : > { %v1106_v16 = vpop.eup %1105  ;;  %v646_v17 = vmul.f32 %v1104_v14, %v587_v58 }
 0x143   : > { %v647_v18 = vmul.f32 %v1106_v16, %v589_v60 }
 0x144   : > { %v648_v19 = vmul.f32 %v646_v17, %v628_v13 }
 0x145   : > { %v649_v20 = vmul.f32 %v647_v18, %v630_v15 }
 0x146   : > { %v650_v22 = vpack.c.bf16 %v648_v19, %v648_v19 }
 0x147   : > { %v651_v21 = vpack.c.bf16 %v649_v20, %v649_v20 }
 0x149   : > { %819 = vmatprep.mubr.bf16.mxu0 %v651_v21 }
 0x14a   : > { %820 = vmatmul.mubr.bf16.vlgmr.msra.gmra.mrb[4].mxu0 %v650_v22 }
 0x21d   : > { %v1017_v23 = vpop.f32.mrb[4].mxu0 }
 0x21e   : > { %v1018_v25 = vpop.f32.mrb[5].mxu0 }
 0x21f   : > { %v1019_v26 = vadd.f32 %v1018_v25, %v1017_v23  ;;  %v1020_v27 = vpop.f32.mrb[6].mxu0 }
 0x220   : > { %v1021_v28 = vpop.f32.mrb[7].mxu0 }
 0x221   : > { %v822_v29 = vadd.f32 %v1019_v26, %v979_v24 }
 0x223   : > { %827 = vst [vmem:[%s1216_s24] sm:$0xff] %v822_v29 }
 0x224 PF: > { %s828_s16 = sld [smem:[#allocation4 + %s1197_s10]] }
 0x22a   : > { %p996_p5 = scmp.ne.s32.totalorder %s828_s16, 0 }
 0x22b   : > { %v1144_v30 = vmov (!%p996_p5), 0.0  }
 0x22c   : > { %832 = sbr.rel (%p996_p5) target bundleno = 563 (0x233), region = 48  ;;  %833 = vst [vmem:[%s1216_s24] sm:$0xff] (!%p996_p5), %v1144_v30 }
 0x233 PF: > { %s27_s1 = sadd.s32 1, %s1139_s1  }
 0x234   : > { %p24_p6 = scmp.ge.s32.totalorder %s27_s1, 20  }
 0x236   :  { %26 = sbr.rel (!%p24_p6) target bundleno = 26 (0x1a), region = 90 }

</bundles_post_ra>
